<compile_context>
chip_gen: v6e
topology: v6e:2x2x1
jax: 0.10.0
libtpu: 0.0.40
codegen_flags: <defaults>
</compile_context>

<pallas_src>
import math
import jax
import jax.numpy as jnp
from jax import lax
from jax.experimental import pallas as pl
from jax.experimental.pallas import tpu as pltpu


def _round_up(x, m):
    return ((x + m - 1) // m) * m


def cosine_linear_kernel(x_ref, w_ref, invx_ref, invw_ref, o_ref):
    # Raw MXU contraction over K (no transpose materialised).
    acc = lax.dot_general(
        x_ref[...], w_ref[...],
        dimension_numbers=(((1,), (1,)), ((), ())),
        preferred_element_type=jnp.float32)            # (TM, TN)

    # Epilogue: row scale (TM,1) carries sigma/||x_row||, column scale (1,TN)
    # carries 1/||w_row||.  Pure VPU work, hidden under the MXU.
    o_ref[...] = ((acc * invx_ref[...]) * invw_ref[...]).astype(o_ref.dtype)


def cosine_linear(x, weight, sigma=None, *, tm_max=256, tn_max=512):
    """x: (B, in_features) f32; weight: (out_features, in_features) f32;
    sigma: (1,) f32 array or None (module variant with sigma=False).
    Returns sigma * cosine_similarity(x, weight) : (B, out_features) f32."""
    B, K = x.shape
    OUT, K2 = weight.shape
    assert K == K2

    eps = 1e-12  # F.normalize default eps

    # Tile sizes: sublane-aligned batch tile, lane-dense output tile.
    TM = min(tm_max, _round_up(B, 8))
    TN = min(tn_max, _round_up(OUT, 128))
    Bp = _round_up(B, TM)
    OUTp = _round_up(OUT, TN)

    xp = x if Bp == B else jnp.pad(x, ((0, Bp - B), (0, 0)))
    wp = weight if OUTp == OUT else jnp.pad(weight, ((0, OUTp - OUT), (0, 0)))

    s = jnp.float32(1.0) if sigma is None else sigma.reshape(()).astype(jnp.float32)

    # rsqrt(max(sumsq, eps^2)) == 1 / max(||v||, eps)  (exact F.normalize clamp).
    # Computed once here instead of once per output tile inside the kernel.
    inv_x = (s * lax.rsqrt(jnp.maximum(jnp.sum(xp * xp, axis=1), eps * eps)))
    inv_x = inv_x.reshape(Bp, 1).astype(jnp.float32)
    inv_w = lax.rsqrt(jnp.maximum(jnp.sum(wp * wp, axis=1), eps * eps))
    inv_w = inv_w.reshape(1, OUTp).astype(jnp.float32)

    grid = (Bp // TM, OUTp // TN)

    out = pl.pallas_call(
        cosine_linear_kernel,
        out_shape=jax.ShapeDtypeStruct((Bp, OUTp), jnp.float32),
        grid_spec=pltpu.PrefetchScalarGridSpec(
            num_scalar_prefetch=0,
            grid=grid,
            in_specs=[
                pl.BlockSpec((TM, K), lambda i, j: (i, 0)),   # x tile
                pl.BlockSpec((TN, K), lambda i, j: (j, 0)),   # W tile
                pl.BlockSpec((TM, 1), lambda i, j: (i, 0)),   # sigma/||x_row||
                pl.BlockSpec((1, TN), lambda i, j: (0, j)),   # 1/||W_row||
            ],
            out_specs=pl.BlockSpec((TM, TN), lambda i, j: (i, j)),
        ),
        compiler_params=pltpu.CompilerParams(
            dimension_semantics=("parallel", "parallel")),
        cost_estimate=pl.CostEstimate(
            flops=2 * Bp * OUTp * K,
            transcendentals=0,
            bytes_accessed=4 * (Bp * K                 # x fetched once per i
                                + OUTp * K * grid[0]   # W streamed per i
                                + Bp * OUTp            # output
                                + Bp + OUTp)),         # norm vectors
    )(xp, wp, inv_x, inv_w)

    return out[:B, :OUT]


def reference(x, weight, sigma):
    eps = 1e-12
    xn = x / jnp.maximum(jnp.linalg.norm(x, axis=1, keepdims=True), eps)
    wn = weight / jnp.maximum(jnp.linalg.norm(weight, axis=1, keepdims=True), eps)
    s = 1.0 if sigma is None else sigma[0]
    return s * (xn @ wn.T)


if __name__ == "__main__":
    key = jax.random.PRNGKey(0)

    # --- Test 1: small shapes from the module (single-tile grid) -----------
    B, in_features, out_features = 8, 32, 16
    kx, kw, kx2, kw2 = jax.random.split(key, 4)
    x = jax.random.normal(kx, (B, in_features), dtype=jnp.float32)

    # Deterministic init matching reset_parameters():
    #   weight ~ U(-stdv, stdv) with stdv = 1/sqrt(in_features); sigma = 1.0
    stdv = 1.0 / math.sqrt(in_features)
    weight = jax.random.uniform(
        kw, (out_features, in_features), minval=-stdv, maxval=stdv,
        dtype=jnp.float32)
    sigma = jnp.ones((1,), dtype=jnp.float32)

    out = jax.block_until_ready(cosine_linear(x, weight, sigma))
    ref = reference(x, weight, sigma)
    assert out.shape == (B, out_features)
    assert jnp.allclose(out, ref, atol=1e-5, rtol=1e-5), (
        f"max abs err = {jnp.max(jnp.abs(out - ref))}")

    # --- Test 2: exercise multi-tile grid + padding (small forced tiles) ---
    B2, in2, out2 = 40, 64, 300
    x2 = jax.random.normal(kx2, (B2, in2), dtype=jnp.float32)
    stdv2 = 1.0 / math.sqrt(in2)
    w2 = jax.random.uniform(kw2, (out2, in2), minval=-stdv2, maxval=stdv2,
                            dtype=jnp.float32)
    sigma2 = jnp.array([2.5], dtype=jnp.float32)

    out2_arr = jax.block_until_ready(
        cosine_linear(x2, w2, sigma2, tm_max=16, tn_max=128))
    ref2 = reference(x2, w2, sigma2)
    assert out2_arr.shape == (B2, out2)
    assert jnp.allclose(out2_arr, ref2, atol=1e-5, rtol=1e-5), (
        f"max abs err = {jnp.max(jnp.abs(out2_arr - ref2))}")

    # --- Test 3: sigma=None module variant ---------------------------------
    out3 = jax.block_until_ready(cosine_linear(x, weight, None))
    ref3 = reference(x, weight, None)
    assert jnp.allclose(out3, ref3, atol=1e-5, rtol=1e-5), (
        f"max abs err = {jnp.max(jnp.abs(out3 - ref3))}")

    print("KERNEL_OK")
</pallas_src>

<mosaic_0001>
module attributes {stable_mosaic.version = 11 : i64} {
  func.func @cosine_linear_kernel(%arg0: i32, %arg1: i32, %arg2: memref<8x32xf32, #tpu.memory_space<vmem>>, %arg3: memref<128x32xf32, #tpu.memory_space<vmem>>, %arg4: memref<8x1xf32, #tpu.memory_space<vmem>>, %arg5: memref<1x128xf32, #tpu.memory_space<vmem>>, %arg6: memref<8x128xf32, #tpu.memory_space<vmem>>) attributes {dimension_semantics = [#tpu.dimension_semantics<parallel>, #tpu.dimension_semantics<parallel>], iteration_bounds = array<i64: 1, 1>, scalar_prefetch = 0 : i64, scratch_operands = 0 : i64, tpu.core_type = #tpu.core_type<tc>, window_params = [{transform_indices = @transform_0, window_bounds = array<i64: 8, 32>}, {transform_indices = @transform_1, window_bounds = array<i64: 128, 32>}, {transform_indices = @transform_2, window_bounds = array<i64: 8, 1>}, {transform_indices = @transform_3, window_bounds = array<i64: 1, 128>}, {transform_indices = @transform_4, window_bounds = array<i64: 8, 128>}]} {
    %c0 = arith.constant 0 : index
    %c0_0 = arith.constant 0 : index
    %0 = vector.load %arg2[%c0, %c0_0] : memref<8x32xf32, #tpu.memory_space<vmem>>, vector<8x32xf32>
    %c0_1 = arith.constant 0 : index
    %c0_2 = arith.constant 0 : index
    %1 = vector.load %arg3[%c0_1, %c0_2] : memref<128x32xf32, #tpu.memory_space<vmem>>, vector<128x32xf32>
    %cst = arith.constant dense<0.000000e+00> : vector<8x128xf32>
    %2 = tpu.matmul %0, %1, %cst {dimension_numbers = #tpu.dot_dimension_numbers<[1], [1], [0], [0], [0, 0, 1, 0], [], []>} : vector<8x32xf32>, vector<128x32xf32>, vector<8x128xf32> -> vector<8x128xf32>
    %c0_3 = arith.constant 0 : index
    %c0_4 = arith.constant 0 : index
    %3 = vector.load %arg4[%c0_3, %c0_4] : memref<8x1xf32, #tpu.memory_space<vmem>>, vector<8x1xf32>
    %4 = vector.broadcast %3 : vector<8x1xf32> to vector<8x128xf32>
    %5 = arith.mulf %2, %4 : vector<8x128xf32>
    %c0_5 = arith.constant 0 : index
    %c0_6 = arith.constant 0 : index
    %6 = vector.load %arg5[%c0_5, %c0_6] : memref<1x128xf32, #tpu.memory_space<vmem>>, vector<1x128xf32>
    %7 = vector.broadcast %6 : vector<1x128xf32> to vector<8x128xf32>
    %8 = arith.mulf %5, %7 : vector<8x128xf32>
    %c0_7 = arith.constant 0 : index
    %c0_8 = arith.constant 0 : index
    %9 = vector.load %arg6[%c0_7, %c0_8] : memref<8x128xf32, #tpu.memory_space<vmem>>, vector<8x128xf32>
    tpu.vector_store %arg6[%c0_7, %c0_8], %8 {strides = array<i32>} : memref<8x128xf32, #tpu.memory_space<vmem>>, vector<8x128xf32>,
    return
  }
  func.func @transform_0(%arg0: i32, %arg1: i32) -> (i32, i32) {
    %c0_i32 = arith.constant 0 : i32
    %c0_i32_0 = arith.constant 0 : i32
    return %arg0, %c0_i32 : i32, i32
  }
  func.func @transform_1(%arg0: i32, %arg1: i32) -> (i32, i32) {
    %c0_i32 = arith.constant 0 : i32
    %c0_i32_0 = arith.constant 0 : i32
    return %arg1, %c0_i32 : i32, i32
  }
  func.func @transform_2(%arg0: i32, %arg1: i32) -> (i32, i32) {
    %c0_i32 = arith.constant 0 : i32
    %c0_i32_0 = arith.constant 0 : i32
    return %arg0, %c0_i32 : i32, i32
  }
  func.func @transform_3(%arg0: i32, %arg1: i32) -> (i32, i32) {
    %c0_i32 = arith.constant 0 : i32
    %c0_i32_0 = arith.constant 0 : i32
    return %c0_i32, %arg1 : i32, i32
  }
  func.func @transform_4(%arg0: i32, %arg1: i32) -> (i32, i32) {
    %c0_i32 = arith.constant 0 : i32
    return %arg0, %arg1 : i32, i32
  }
}

</mosaic_0001>

<bundles_post_ra>
// kernel: tpu_custom_call.1
= control target key start
LH: loop header
LB: loop body
LE: loop exit
PB: predicated region body
PF: predicated region fallthrough
CT: control target
= control target key end

     0   :  { %vm35_vm0 = vcmask 261120   ;;  %v284_v1 = vmov 0.0   ;;  %vm285_vm1 = vmmov 0   ;;  %v286_v2 = vmov 0   ;;  %s390_s0 = inlined_call_operand.vmem [shape: f32[8,32], index: 0, kind: input, shape index: {}]   ;;  %s391_s1 = inlined_call_operand.vmem [shape: f32[128,32], index: 1, kind: input, shape index: {}]   ;;  %s392_s2 = inlined_call_operand.vmem [shape: f32[8,1], index: 2, kind: input, shape index: {}]   ;;  %s393_s3 = inlined_call_operand.vmem [shape: f32[1,128], index: 3, kind: input, shape index: {}]   ;;  %s394_s4 = inlined_call_operand.hbm [shape: f32[8,128], index: 4, kind: output, shape index: {}]  }
   0x1   :  { %v34_v0 = vld [vmem:[%s391_s1 + $0x78] sm:$0xff]  ;;  %222 = vmatprep.subr.mxu0 %v284_v1  ;;  %254 = vmatprep.mubr.msk.f32.mxu0 %vm285_vm1, %v284_v1  ;;  %v33_v3 = vld [vmem:[%s391_s1 + $0x70] sm:$0xff]  ;;  %v157_v4 = vld [vmem:[%s392_s2] sm:$0xff] }
   0x2   :  { %223 = vmatpush3.xpose.msk.msra.mxu0 %vm35_vm0, %v34_v0  ;;  %261 = vset.pattern.permute.xlu0 %v286_v2 }
   0x3   :  { %224 = vmatprep.subr.mxu0 %v284_v1  ;;  %160 = vperm.xlu0 %261, %v157_v4  }
   0x6   :  { %225 = vmatpush3.xpose.msk.msra.mxu0 %vm35_vm0, %v33_v3 }
   0x7   :  { %9 = vsyncpa [#allocation3], 0  ;;  %226 = vmatprep.subr.mxu0 %v284_v1  ;;  %v32_v5 = vld [vmem:[%s391_s1 + $0x68] sm:$0xff]  ;;  %v31_v6 = vld [vmem:[%s391_s1 + $0x60] sm:$0xff]  ;;  %s287_s25 = smov [#allocation2]  }
   0x8   :  { %v30_v7 = vld [vmem:[%s391_s1 + $0x58] sm:$0xff]  ;;  %v29_v8 = vld [vmem:[%s391_s1 + $0x50] sm:$0xff]  ;;  %v28_v9 = vld [vmem:[%s391_s1 + $0x48] sm:$0xff]  ;;  %s179_s26 = sshll.u32 %s287_s25, 4  ;;  %s180_s26 = int_to_ptr.vmem [resolvable:$true] %s179_s26 }
   0x9   :  { %v27_v10 = vld [vmem:[%s391_s1 + $0x40] sm:$0xff]  ;;  %v26_v11 = vld [vmem:[%s391_s1 + $0x38] sm:$0xff]  ;;  %v25_v12 = vld [vmem:[%s391_s1 + $0x30] sm:$0xff]  ;;  %p267_p1 = scmp.lt.s32.totalorder %s180_s26, %s180_s26 }
   0xa   :  { %227 = vmatpush3.xpose.msk.msra.mxu0 %vm35_vm0, %v32_v5  ;;  %v24_v13 = vld [vmem:[%s391_s1 + $0x28] sm:$0xff]  ;;  %v23_v14 = vld [vmem:[%s391_s1 + $0x20] sm:$0xff]  ;;  %v22_v15 = vld [vmem:[%s391_s1 + $0x18] sm:$0xff] }
   0xb   :  { %228 = vmatprep.subr.mxu0 %v284_v1  ;;  %v21_v16 = vld [vmem:[%s391_s1 + $0x10] sm:$0xff]  ;;  %v20_v17 = vld [vmem:[%s391_s1 + $0x8] sm:$0xff]  ;;  %v19_v18 = vld [vmem:[%s391_s1] sm:$0xff]  ;;  %s262_s1 = scalar_lea.vmem %s180_s26, 128 }
   0xc   :  { %v18_v19 = vld [vmem:[%s390_s0] sm:$0xff]  ;;  %p263_p0 = scmp.ne.s32.totalorder %s180_s26, %s262_s1  ;;  %p268_p2 = scmp.lt.s32.totalorder %s262_s1, %s262_s1 }
   0xd   :  { %v204_v22 = vld [vmem:[%s393_s3] ss:$0 sm:$0xff] }
   0xe   :  { %229 = vmatpush3.xpose.msk.msra.mxu0 %vm35_vm0, %v31_v6  ;;  %p269_p3 = por %p268_p2, %p267_p1 }
   0xf   :  { %230 = vmatprep.subr.mxu0 %v284_v1 }
  0x10   :  { %p270_p4 = pnand %p269_p3, %p263_p0 }
  0x12   :  { %231 = vmatpush3.xpose.msk.msra.mxu0 %vm35_vm0, %v30_v7 }
  0x13   :  { %232 = vmatprep.subr.mxu0 %v284_v1 }
  0x16   :  { %233 = vmatpush3.xpose.msk.msra.mxu0 %vm35_vm0, %v29_v8 }
  0x17   :  { %234 = vmatprep.subr.mxu0 %v284_v1 }
  0x1a   :  { %235 = vmatpush3.xpose.msk.msra.mxu0 %vm35_vm0, %v28_v9 }
  0x1b   :  { %236 = vmatprep.subr.mxu0 %v284_v1 }
  0x1e   :  { %237 = vmatpush3.xpose.msk.msra.mxu0 %vm35_vm0, %v27_v10 }
  0x1f   :  { %238 = vmatprep.subr.mxu0 %v284_v1 }
  0x22   :  { %239 = vmatpush3.xpose.msk.msra.mxu0 %vm35_vm0, %v26_v11 }
  0x23   :  { %240 = vmatprep.subr.mxu0 %v284_v1 }
  0x26   :  { %241 = vmatpush3.xpose.msk.msra.mxu0 %vm35_vm0, %v25_v12 }
  0x27   :  { %242 = vmatprep.subr.mxu0 %v284_v1 }
  0x2a   :  { %243 = vmatpush3.xpose.msk.msra.mxu0 %vm35_vm0, %v24_v13 }
  0x2b   :  { %244 = vmatprep.subr.mxu0 %v284_v1 }
  0x2e   :  { %245 = vmatpush3.xpose.msk.msra.mxu0 %vm35_vm0, %v23_v14 }
  0x2f   :  { %246 = vmatprep.subr.mxu0 %v284_v1 }
  0x32   :  { %247 = vmatpush3.xpose.msk.msra.mxu0 %vm35_vm0, %v22_v15 }
  0x33   :  { %248 = vmatprep.subr.mxu0 %v284_v1 }
  0x36   :  { %249 = vmatpush3.xpose.msk.msra.mxu0 %vm35_vm0, %v21_v16 }
  0x37   :  { %250 = vmatprep.subr.mxu0 %v284_v1 }
  0x3a   :  { %251 = vmatpush3.xpose.msk.msra.mxu0 %vm35_vm0, %v20_v17 }
  0x3b   :  { %252 = vmatprep.subr.mxu0 %v284_v1 }
  0x3e   :  { %253 = vmatpush3.xpose.msk.msra.mxu0 %vm35_vm0, %v19_v18 }
  0x41   :  { %255 = vmatmul.mubr.msk.f32.vlgmr.msra.gmra.mxu0 %vm35_vm0, %v18_v19 }
  0x7e   :  { %v161_v20 = vpop.permute.xlu0 %160 }
 0x101   :  { %v153_v21 = vpop.f32.mrf.mxu0 }
 0x102   :  { %v163_v23 = vmul.f32 %v161_v20, %v153_v21 }
 0x103   :  { %v256_v24 = vpop.f32.mrf.mxu0 }
 0x104   :  { %v171_v25 = vmul.f32 %v204_v22, %v163_v23 }
 0x106   :  { %172 = vst [vmem:[#allocation2] sm:$0xff] %v171_v25 }
 0x107   :  { %273 = shalt.err (!%p270_p4)
}
 0x108   :  { %182 = dma.vmem_to_hbm [thread:$0]  %s180_s26, 128, %s394_s4, [#allocation3]  }
 0x109   :  { %282 = dma.done.wait [#allocation3], 128  }
 0x10a   :  { %283 = vsyncadd [#allocation3], 4294967168 }
 0x10b   :  { %186 = vsyncpa [#allocation3], 1 }

</bundles_post_ra>
